<compile_context>
chip_gen: v7x
topology: tpu7x:2x2x1
jax: 0.10.0
libtpu: 0.0.40
codegen_flags: <defaults>
</compile_context>

<pallas_src>
import functools

import jax
import jax.numpy as jnp
from jax import lax
from jax.experimental import pallas as pl
from jax.experimental.pallas import tpu as pltpu

_SMALL_C = 16          # use the VPU (not the MXU) for the channel relation
_BF16_MIN_C = 128      # bf16 matmul operands only in the compute-bound regime
_NEG_BIG = -3.0e38     # finite "-inf" for masked softmax (no inf-inf NaNs)


# ---------------------------------------------------------------------------
# Hardware-aware sizing helpers
# ---------------------------------------------------------------------------
def _vmem_capacity_bytes():
    cap = None
    try:
        info = pltpu.get_tpu_info()
        cap = int(getattr(info, "vmem_capacity_bytes", 0)) or None
    except Exception:
        cap = None
    if cap is None:
        try:
            kind = jax.devices()[0].device_kind.lower()
        except Exception:
            kind = ""
        cap = 64 * 1024 * 1024 if "v7" in kind else 128 * 1024 * 1024
    return cap


def _num_tensorcores():
    try:
        if "v7" in jax.devices()[0].device_kind.lower():
            return 2
    except Exception:
        pass
    # 64 MiB VMEM per core is the v7x signature.
    return 2 if _vmem_capacity_bytes() <= 80 * 1024 * 1024 else 1


def _budget_and_limit():
    cap = _vmem_capacity_bytes()
    if cap <= 80 * 1024 * 1024:                       # v7x-class: 64 MiB / TC
        return 14 * 1024 * 1024, 48 * 1024 * 1024
    return 32 * 1024 * 1024, 96 * 1024 * 1024         # v5e / v6e: 128 MiB


def _single_pass_bytes_per_batch(C, N, is_vec, in_bytes, out_bytes, small_c):
    """Estimated per-batch-row VMEM footprint of one single-pass grid step."""
    f32 = 4
    x_io = 2 * C * N * in_bytes                       # double-buffered input
    out_io = 2 * (C * 1 if is_vec else C * N) * out_bytes
    temps = C * N * f32                               # e
    if in_bytes != f32:
        temps += C * N * f32                          # f32 upcast of x
    if small_c:
        temps += 2 * C * N * f32                      # VPU accumulator + product
    else:
        temps += C * C * f32                          # cr
        if (not is_vec) and out_bytes != f32:
            temps += C * N * f32                      # f32 result before downcast
    return x_io + out_io + temps


def _pick_batch_tile(B, per_batch_bytes, budget, max_tb):
    tb = max(1, min(max_tb, budget // max(per_batch_bytes, 1)))
    tb = min(tb, B)
    steps = -(-B // tb)
    return -(-B // steps)       # shrink tb to minimize padding at equal #steps


def _pick_n_tile(C, N, is_vec, in_bytes, out_bytes, cr_bytes, budget):
    f32 = 4
    # linear VMEM models (conservative): bytes(tn) = fixed + per_elem * tn
    p1_fixed = 2 * C * C * f32 + 2 * C * C * cr_bytes + 4 * C * f32
    p1_per = C * (2 * in_bytes + 2 * f32)
    if is_vec:
        fixed, per = p1_fixed, p1_per
    else:
        p2_fixed = 2 * C * C * cr_bytes
        p2_per = C * (2 * in_bytes + 2 * out_bytes + f32)
        fixed, per = max(p1_fixed, p2_fixed), max(p1_per, p2_per)
    k = 1
    if budget > fixed:
        k = max(1, int((budget - fixed) // (per * 128)))
    n_pad_max = -(-N // 128) * 128
    return max(128, min(128 * k, n_pad_max))


# ---------------------------------------------------------------------------
# Single-pass kernels (whole (tb, C, N) tile per grid step)
# ---------------------------------------------------------------------------
def _softmax_pieces(x):
    """x: (TB, C, N) f32 -> (e, 1/sum(e)) with e = exp(x - rowmax)."""
    m = jnp.max(x, axis=-1, keepdims=True)
    e = jnp.exp(x - m)
    s = jnp.sum(e, axis=-1, keepdims=True)
    return e, pl.reciprocal(s, approx=True)           # EUP; VALU stays free


def _single_full_kernel(x_ref, o_ref, *, small_c, use_bf16):
    x = x_ref[...].astype(jnp.float32)                 # (TB, C, N)
    e, inv_s = _softmax_pieces(x)
    C = x.shape[1]
    if small_c:
        # Tiny C: a padded (C x C) MXU matmul wastes >97% of the systolic
        # array, so build/apply cr columns on the VPU instead.
        out = jnp.zeros_like(x)
        for d in range(C):
            xd = x[:, d:d + 1, :]                                   # (TB, 1, N)
            col = jnp.sum(e * xd, axis=-1, keepdims=True) * inv_s   # cr[:, :, d]
            out = out + col * xd
    else:
        a = e.astype(jnp.bfloat16) if use_bf16 else e
        b = x.astype(jnp.bfloat16) if use_bf16 else x
        cr = lax.dot_general(a, b, (((2,), (2,)), ((0,), (0,))),
                             preferred_element_type=jnp.float32)    # (TB, C, C)
        cr = cr * inv_s              # denominator folded into C*C rows
        crm = cr.astype(jnp.bfloat16) if use_bf16 else cr
        out = lax.dot_general(crm, b, (((2,), (1,)), ((0,), (0,))),
                              preferred_element_type=jnp.float32)   # (TB, C, N)
    o_ref[...] = out.astype(o_ref.dtype)


def _single_vec_kernel(x_ref, o_ref, *, small_c, use_bf16):
    x = x_ref[...].astype(jnp.float32)                 # (TB, C, N)
    e, inv_s = _softmax_pieces(x)
    # mean is linear: mean_N(cr @ x) == cr @ mean_N(x)
    x_mean = jnp.mean(x, axis=-1, keepdims=True)       # (TB, C, 1)
    C = x.shape[1]
    if small_c:
        out = jnp.zeros(x.shape[:2] + (1,), jnp.float32)
        for d in range(C):
            xd = x[:, d:d + 1, :]
            col = jnp.sum(e * xd, axis=-1, keepdims=True) * inv_s
            out = out + col * x_mean[:, d:d + 1, :]
    else:
        a = e.astype(jnp.bfloat16) if use_bf16 else e
        b = x.astype(jnp.bfloat16) if use_bf16 else x
        cr = lax.dot_general(a, b, (((2,), (2,)), ((0,), (0,))),
                             preferred_element_type=jnp.float32) * inv_s
        crm = cr.astype(jnp.bfloat16) if use_bf16 else cr
        xm = x_mean.astype(jnp.bfloat16) if use_bf16 else x_mean
        out = lax.dot_general(crm, xm, (((2,), (1,)), ((0,), (0,))),
                              preferred_element_type=jnp.float32)   # (TB, C, 1)
    o_ref[...] = out.astype(o_ref.dtype)


def _trilinear_single_pass(x_flat, is_vec, small_c, use_bf16, budget, vmem_limit):
    B, C, N = x_flat.shape
    in_bytes = x_flat.dtype.itemsize
    per_batch = _single_pass_bytes_per_batch(C, N, is_vec, in_bytes, in_bytes, small_c)
    # On 2-TC chips keep >= 2 grid steps so both cores get a share of the
    # "parallel" batch axis.
    max_tb = B if (_num_tensorcores() < 2 or B < 2) else max(1, B // 2)
    tb = _pick_batch_tile(B, per_batch, budget, max_tb)
    steps = -(-B // tb)
    b_pad = steps * tb
    if b_pad != B:
        x_flat = jnp.pad(x_flat, ((0, b_pad - B), (0, 0), (0, 0)))

    cparams = pltpu.CompilerParams(
        dimension_semantics=("parallel",), vmem_limit_bytes=vmem_limit)
    out_elems = b_pad * C if is_vec else b_pad * C * N
    cost = pl.CostEstimate(
        flops=(2 if is_vec else 4) * b_pad * C * C * N,
        transcendentals=b_pad * C * N,
        bytes_accessed=b_pad * C * N * in_bytes + out_elems * in_bytes)

    in_spec = pl.BlockSpec((tb, C, N), lambda b: (b, 0, 0))
    if is_vec:
        kern = functools.partial(_single_vec_kernel, small_c=small_c, use_bf16=use_bf16)
        out = pl.pallas_call(
            kern,
            out_shape=jax.ShapeDtypeStruct((b_pad, C, 1), x_flat.dtype),
            grid=(steps,),
            in_specs=[in_spec],
            out_specs=pl.BlockSpec((tb, C, 1), lambda b: (b, 0, 0)),
            compiler_params=cparams,
            cost_estimate=cost,
        )(x_flat)
        return out[:B, :, 0]
    kern = functools.partial(_single_full_kernel, small_c=small_c, use_bf16=use_bf16)
    out = pl.pallas_call(
        kern,
        out_shape=jax.ShapeDtypeStruct((b_pad, C, N), x_flat.dtype),
        grid=(steps,),
        in_specs=[in_spec],
        out_specs=pl.BlockSpec((tb, C, N), lambda b: (b, 0, 0)),
        compiler_params=cparams,
        cost_estimate=cost,
    )(x_flat)
    return out[:B]


# ---------------------------------------------------------------------------
# N-tiled online-softmax path (large C*N that cannot fit a single tile)
# ---------------------------------------------------------------------------
def _online_cr_step(x, n_idx, n_valid, m_sc, s_sc, cr_sc, *, use_bf16, use_mask):
    tn = x.shape[-1]
    if use_mask:
        lane = lax.broadcasted_iota(jnp.int32, x.shape, dimension=2)
        valid = (n_idx * tn + lane) < n_valid
        x_max_in = jnp.where(valid, x, _NEG_BIG)
    else:
        valid = None
        x_max_in = x
    m_prev = m_sc[...]
    m_new = jnp.maximum(m_prev, jnp.max(x_max_in, axis=-1, keepdims=True))
    alpha = jnp.exp(m_prev - m_new)
    e = jnp.exp(x - m_new)
    if valid is not None:
        e = jnp.where(valid, e, 0.0)
    s_sc[...] = alpha * s_sc[...] + jnp.sum(e, axis=-1, keepdims=True)
    a = e.astype(jnp.bfloat16) if use_bf16 else e
    b = x.astype(jnp.bfloat16) if use_bf16 else x
    part = lax.dot_general(a, b, (((2,), (2,)), ((0,), (0,))),
                           preferred_element_type=jnp.float32)      # (1, C, C)
    cr_sc[...] = alpha * cr_sc[...] + part
    m_sc[...] = m_new


def _ntiled_cr_kernel(x_ref, cr_ref, m_sc, s_sc, cr_sc, *, n_valid, use_bf16, use_mask):
    n = pl.program_id(1)

    @pl.when(n == 0)
    def _():
        m_sc[...] = jnp.full_like(m_sc, _NEG_BIG)
        s_sc[...] = jnp.zeros_like(s_sc)
        cr_sc[...] = jnp.zeros_like(cr_sc)

    x = x_ref[...].astype(jnp.float32)                 # (1, C, TN)
    _online_cr_step(x, n, n_valid, m_sc, s_sc, cr_sc,
                    use_bf16=use_bf16, use_mask=use_mask)

    @pl.when(n == pl.num_programs(1) - 1)
    def _():
        inv_s = pl.reciprocal(s_sc[...], approx=True)
        cr_ref[...] = (cr_sc[...] * inv_s).astype(cr_ref.dtype)


def _ntiled_vec_kernel(x_ref, o_ref, m_sc, s_sc, cr_sc, xs_sc,
                       *, n_valid, use_bf16, use_mask):
    n = pl.program_id(1)

    @pl.when(n == 0)
    def _():
        m_sc[...] = jnp.full_like(m_sc, _NEG_BIG)
        s_sc[...] = jnp.zeros_like(s_sc)
        cr_sc[...] = jnp.zeros_like(cr_sc)
        xs_sc[...] = jnp.zeros_like(xs_sc)

    x = x_ref[...].astype(jnp.float32)
    xs_sc[...] += jnp.sum(x, axis=-1, keepdims=True)   # N padding is exact zeros
    _online_cr_step(x, n, n_valid, m_sc, s_sc, cr_sc,
                    use_bf16=use_bf16, use_mask=use_mask)

    @pl.when(n == pl.num_programs(1) - 1)
    def _():
        inv_s = pl.reciprocal(s_sc[...], approx=True)
        cr = cr_sc[...] * inv_s
        x_mean = xs_sc[...] * (1.0 / n_valid)
        out = lax.dot_general(cr, x_mean, (((2,), (1,)), ((0,), (0,))),
                              preferred_element_type=jnp.float32)   # (1, C, 1)
        o_ref[...] = out.astype(o_ref.dtype)


def _ntiled_apply_kernel(cr_ref, x_ref, o_ref, *, use_bf16):
    mm = jnp.bfloat16 if use_bf16 else jnp.float32
    out = lax.dot_general(cr_ref[...].astype(mm), x_ref[...].astype(mm),
                          (((2,), (1,)), ((0,), (0,))),
                          preferred_element_type=jnp.float32)       # (1, C, TN)
    o_ref[...] = out.astype(o_ref.dtype)


def _trilinear_n_tiled(x_flat, is_vec, use_bf16, budget, vmem_limit, n_tile=None):
    B, C, N = x_flat.shape
    in_bytes = x_flat.dtype.itemsize
    cr_dtype = jnp.bfloat16 if use_bf16 else jnp.float32
    cr_bytes = jnp.dtype(cr_dtype).itemsize
    if n_tile is not None:
        tn = max(128, -(-int(n_tile) // 128) * 128)
    else:
        tn = _pick_n_tile(C, N, is_vec, in_bytes, in_bytes, cr_bytes, budget)
    n_steps = -(-N // tn)
    n_pad = n_steps * tn
    if n_pad != N:
        x_flat = jnp.pad(x_flat, ((0, 0), (0, 0), (0, n_pad - N)))
    use_mask = n_pad != N

    cparams = pltpu.CompilerParams(
        dimension_semantics=("parallel", "arbitrary"), vmem_limit_bytes=vmem_limit)
    x_spec = pl.BlockSpec((1, C, tn), lambda b, n: (b, 0, n))
    scratch = [pltpu.VMEM((1, C, 1), jnp.float32),     # running max
               pltpu.VMEM((1, C, 1), jnp.float32),     # running denominator
               pltpu.VMEM((1, C, C), jnp.float32)]     # running channel relation

    if is_vec:
        kern = functools.partial(_ntiled_vec_kernel, n_valid=N,
                                 use_bf16=use_bf16, use_mask=use_mask)
        out = pl.pallas_call(
            kern,
            out_shape=jax.ShapeDtypeStruct((B, C, 1), x_flat.dtype),
            grid=(B, n_steps),
            in_specs=[x_spec],
            out_specs=pl.BlockSpec((1, C, 1), lambda b, n: (b, 0, 0)),
            scratch_shapes=scratch + [pltpu.VMEM((1, C, 1), jnp.float32)],
            compiler_params=cparams,
            cost_estimate=pl.CostEstimate(
                flops=2 * B * C * C * n_pad, transcendentals=B * C * n_pad,
                bytes_accessed=B * C * n_pad * in_bytes + B * C * in_bytes),
        )(x_flat)
        return out[:, :, 0]

    kern = functools.partial(_ntiled_cr_kernel, n_valid=N,
                             use_bf16=use_bf16, use_mask=use_mask)
    cr = pl.pallas_call(
        kern,
        out_shape=jax.ShapeDtypeStruct((B, C, C), cr_dtype),
        grid=(B, n_steps),
        in_specs=[x_spec],
        out_specs=pl.BlockSpec((1, C, C), lambda b, n: (b, 0, 0)),
        scratch_shapes=scratch,
        compiler_params=cparams,
        cost_estimate=pl.CostEstimate(
            flops=2 * B * C * C * n_pad, transcendentals=B * C * n_pad,
            bytes_accessed=B * C * n_pad * in_bytes + B * C * C * cr_bytes),
    )(x_flat)

    # Second pass: out = cr @ x per N tile (both grid axes independent).
    # TODO(synk): for C so large that a (C, C) cr block itself strains VMEM
    # (C >~ 4096 on v7x), additionally tile cr over its first axis.
    out = pl.pallas_call(
        functools.partial(_ntiled_apply_kernel, use_bf16=use_bf16),
        out_shape=jax.ShapeDtypeStruct((B, C, n_pad), x_flat.dtype),
        grid=(B, n_steps),
        in_specs=[pl.BlockSpec((1, C, C), lambda b, n: (b, 0, 0)), x_spec],
        out_specs=pl.BlockSpec((1, C, tn), lambda b, n: (b, 0, n)),
        compiler_params=pltpu.CompilerParams(
            dimension_semantics=("parallel", "parallel"),
            vmem_limit_bytes=vmem_limit),
        cost_estimate=pl.CostEstimate(
            flops=2 * B * C * C * n_pad, transcendentals=0,
            bytes_accessed=B * C * C * cr_bytes + 2 * B * C * n_pad * in_bytes),
    )(cr, x_flat)
    return out[:, :, :N]


# ---------------------------------------------------------------------------
# Public entry point
# ---------------------------------------------------------------------------
def trilinear(x, is_vec: bool, *, force_n_tiled: bool = False, n_tile=None):
    """JAX/Pallas equivalent of TRILINEAR.forward.

    x: (B, C, H, W); bf16 inputs stay bf16 in HBM (upcast happens in VMEM).
    Returns (B, C, H*W) if not is_vec, else squeeze((B, C)) (torch semantics).
    """
    B, C, H, W = x.shape
    N = H * W
    x_flat = x.reshape(B, C, N)

    budget, vmem_limit = _budget_and_limit()
    small_c = C <= _SMALL_C
    use_bf16 = C >= _BF16_MIN_C
    in_bytes = x.dtype.itemsize
    fits_single = _single_pass_bytes_per_batch(
        C, N, is_vec, in_bytes, in_bytes, small_c) <= budget

    if force_n_tiled or not fits_single:
        out = _trilinear_n_tiled(x_flat, is_vec, use_bf16, budget, vmem_limit, n_tile)
    else:
        out = _trilinear_single_pass(x_flat, is_vec, small_c, use_bf16, budget, vmem_limit)
    if is_vec:
        # matches PyTorch .squeeze(): drops ALL size-1 dims (shape-unstable if B==1)
        return jnp.squeeze(out)
    return out


def _trilinear_ref(x, is_vec):
    """Pure-JAX reference for validation."""
    B, C, H, W = x.shape
    xf = x.reshape(B, C, H * W).astype(jnp.float32)
    xn = jax.nn.softmax(xf, axis=2)
    cr = jnp.einsum('bcn,bdn->bcd', xn, xf)
    out = jnp.einsum('bcd,bdn->bcn', cr, xf)
    if is_vec:
        out = jnp.squeeze(out.mean(axis=2))
    return out


if __name__ == "__main__":
    key = jax.random.PRNGKey(0)
    B, C, H, W = 2, 4, 16, 16
    x = jax.random.normal(key, (B, C, H, W), dtype=jnp.float32)

    # Default (single-pass, small-C VPU) path.
    y_vec = trilinear(x, is_vec=True)
    y_full = trilinear(x, is_vec=False)
    jax.block_until_ready((y_vec, y_full))
    r_vec, r_full = _trilinear_ref(x, True), _trilinear_ref(x, False)
    assert y_vec.shape == r_vec.shape and y_full.shape == r_full.shape
    assert jnp.allclose(y_vec, r_vec, atol=5e-3, rtol=5e-3)
    assert jnp.allclose(y_full, r_full, atol=5e-3, rtol=5e-3)

    # N-tiled online-softmax path (auto-selected for large C*N); forced here
    # at a small, non-128-multiple N to exercise tiling + masking.
    x2 = jax.random.normal(jax.random.PRNGKey(1), (2, 4, 15, 15), dtype=jnp.float32)
    y2v = trilinear(x2, is_vec=True, force_n_tiled=True, n_tile=128)
    y2f = trilinear(x2, is_vec=False, force_n_tiled=True, n_tile=128)
    jax.block_until_ready((y2v, y2f))
    assert jnp.allclose(y2v, _trilinear_ref(x2, True), atol=5e-3, rtol=5e-3)
    assert jnp.allclose(y2f, _trilinear_ref(x2, False), atol=5e-3, rtol=5e-3)

    # Mid-C path: f32 MXU matmuls.
    x3 = jax.random.normal(jax.random.PRNGKey(2), (2, 32, 8, 8), dtype=jnp.float32)
    y3v = trilinear(x3, is_vec=True)
    y3f = trilinear(x3, is_vec=False)
    jax.block_until_ready((y3v, y3f))
    assert jnp.allclose(y3v, _trilinear_ref(x3, True), atol=5e-3, rtol=5e-3)
    assert jnp.allclose(y3f, _trilinear_ref(x3, False), atol=5e-3, rtol=5e-3)

    # Large-C path: bf16 MXU operands, f32 accumulation (loose tolerance by design).
    x4 = jax.random.normal(jax.random.PRNGKey(3), (2, 128, 8, 8), dtype=jnp.float32)
    y4v = trilinear(x4, is_vec=True)
    y4f = trilinear(x4, is_vec=False)
    jax.block_until_ready((y4v, y4f))
    assert jnp.allclose(y4v, _trilinear_ref(x4, True), atol=1e-1, rtol=5e-2)
    assert jnp.allclose(y4f, _trilinear_ref(x4, False), atol=1e-1, rtol=5e-2)

    print("KERNEL_OK")
</pallas_src>

<mosaic_0001>
module attributes {stable_mosaic.version = 11 : i64} {
  func.func @_single_vec_kernel(%arg0: i32, %arg1: memref<2x4x256xf32, #tpu.memory_space<vmem>>, %arg2: memref<2x4x1xf32, #tpu.memory_space<vmem>>) attributes {dimension_semantics = [#tpu.dimension_semantics<parallel>], iteration_bounds = array<i64: 1>, scalar_prefetch = 0 : i64, scratch_operands = 0 : i64, tpu.core_type = #tpu.core_type<tc>, window_params = [{transform_indices = @transform_0, window_bounds = array<i64: 2, 4, 256>}, {transform_indices = @transform_1, window_bounds = array<i64: 2, 4, 1>}]} {
    %c0 = arith.constant 0 : index
    %c0_0 = arith.constant 0 : index
    %c0_1 = arith.constant 0 : index
    %0 = vector.load %arg1[%c0, %c0_0, %c0_1] : memref<2x4x256xf32, #tpu.memory_space<vmem>>, vector<2x4x256xf32>
    %cst = arith.constant dense<0xFF800000> : vector<2x4xf32>
    %1 = vector.multi_reduction <maximumf>, %0, %cst [2] : vector<2x4x256xf32> to vector<2x4xf32>
    %2 = vector.shape_cast %1 : vector<2x4xf32> to vector<2x4x1xf32>
    %3 = vector.broadcast %2 : vector<2x4x1xf32> to vector<2x4x256xf32>
    %4 = arith.subf %0, %3 : vector<2x4x256xf32>
    %5 = math.exp %4 : vector<2x4x256xf32>
    %cst_2 = arith.constant dense<0.000000e+00> : vector<2x4xf32>
    %6 = vector.multi_reduction <add>, %5, %cst_2 [2] : vector<2x4x256xf32> to vector<2x4xf32>
    %7 = vector.shape_cast %6 : vector<2x4xf32> to vector<2x4x1xf32>
    %8 = tpu.reciprocal %7 {approx = true} : vector<2x4x1xf32> -> vector<2x4x1xf32>
    %cst_3 = arith.constant dense<0.000000e+00> : vector<2x4xf32>
    %9 = vector.multi_reduction <add>, %0, %cst_3 [2] : vector<2x4x256xf32> to vector<2x4xf32>
    %10 = vector.shape_cast %9 : vector<2x4xf32> to vector<2x4x1xf32>
    %cst_4 = arith.constant 2.560000e+02 : f32
    %11 = vector.broadcast %cst_4 : f32 to vector<2x4x1xf32>
    %12 = arith.divf %10, %11 : vector<2x4x1xf32>
    %cst_5 = arith.constant 0.000000e+00 : f32
    %13 = vector.broadcast %cst_5 : f32 to vector<2x4x1xf32>
    %14 = vector.extract_strided_slice %0 {offsets = [0, 0, 0], sizes = [2, 1, 256], strides = [1, 1, 1]} : vector<2x4x256xf32> to vector<2x1x256xf32>
    %15 = vector.broadcast %14 : vector<2x1x256xf32> to vector<2x4x256xf32>
    %16 = arith.mulf %5, %15 : vector<2x4x256xf32>
    %cst_6 = arith.constant dense<0.000000e+00> : vector<2x4xf32>
    %17 = vector.multi_reduction <add>, %16, %cst_6 [2] : vector<2x4x256xf32> to vector<2x4xf32>
    %18 = vector.shape_cast %17 : vector<2x4xf32> to vector<2x4x1xf32>
    %19 = arith.mulf %18, %8 : vector<2x4x1xf32>
    %20 = vector.extract_strided_slice %12 {offsets = [0, 0, 0], sizes = [2, 1, 1], strides = [1, 1, 1]} : vector<2x4x1xf32> to vector<2x1x1xf32>
    %21 = vector.broadcast %20 : vector<2x1x1xf32> to vector<2x4x1xf32>
    %22 = arith.mulf %19, %21 : vector<2x4x1xf32>
    %23 = arith.addf %13, %22 : vector<2x4x1xf32>
    %24 = vector.extract_strided_slice %0 {offsets = [0, 1, 0], sizes = [2, 1, 256], strides = [1, 1, 1]} : vector<2x4x256xf32> to vector<2x1x256xf32>
    %25 = vector.broadcast %24 : vector<2x1x256xf32> to vector<2x4x256xf32>
    %26 = arith.mulf %5, %25 : vector<2x4x256xf32>
    %cst_7 = arith.constant dense<0.000000e+00> : vector<2x4xf32>
    %27 = vector.multi_reduction <add>, %26, %cst_7 [2] : vector<2x4x256xf32> to vector<2x4xf32>
    %28 = vector.shape_cast %27 : vector<2x4xf32> to vector<2x4x1xf32>
    %29 = arith.mulf %28, %8 : vector<2x4x1xf32>
    %30 = vector.extract_strided_slice %12 {offsets = [0, 1, 0], sizes = [2, 1, 1], strides = [1, 1, 1]} : vector<2x4x1xf32> to vector<2x1x1xf32>
    %31 = vector.broadcast %30 : vector<2x1x1xf32> to vector<2x4x1xf32>
    %32 = arith.mulf %29, %31 : vector<2x4x1xf32>
    %33 = arith.addf %23, %32 : vector<2x4x1xf32>
    %34 = vector.extract_strided_slice %0 {offsets = [0, 2, 0], sizes = [2, 1, 256], strides = [1, 1, 1]} : vector<2x4x256xf32> to vector<2x1x256xf32>
    %35 = vector.broadcast %34 : vector<2x1x256xf32> to vector<2x4x256xf32>
    %36 = arith.mulf %5, %35 : vector<2x4x256xf32>
    %cst_8 = arith.constant dense<0.000000e+00> : vector<2x4xf32>
    %37 = vector.multi_reduction <add>, %36, %cst_8 [2] : vector<2x4x256xf32> to vector<2x4xf32>
    %38 = vector.shape_cast %37 : vector<2x4xf32> to vector<2x4x1xf32>
    %39 = arith.mulf %38, %8 : vector<2x4x1xf32>
    %40 = vector.extract_strided_slice %12 {offsets = [0, 2, 0], sizes = [2, 1, 1], strides = [1, 1, 1]} : vector<2x4x1xf32> to vector<2x1x1xf32>
    %41 = vector.broadcast %40 : vector<2x1x1xf32> to vector<2x4x1xf32>
    %42 = arith.mulf %39, %41 : vector<2x4x1xf32>
    %43 = arith.addf %33, %42 : vector<2x4x1xf32>
    %44 = vector.extract_strided_slice %0 {offsets = [0, 3, 0], sizes = [2, 1, 256], strides = [1, 1, 1]} : vector<2x4x256xf32> to vector<2x1x256xf32>
    %45 = vector.broadcast %44 : vector<2x1x256xf32> to vector<2x4x256xf32>
    %46 = arith.mulf %5, %45 : vector<2x4x256xf32>
    %cst_9 = arith.constant dense<0.000000e+00> : vector<2x4xf32>
    %47 = vector.multi_reduction <add>, %46, %cst_9 [2] : vector<2x4x256xf32> to vector<2x4xf32>
    %48 = vector.shape_cast %47 : vector<2x4xf32> to vector<2x4x1xf32>
    %49 = arith.mulf %48, %8 : vector<2x4x1xf32>
    %50 = vector.extract_strided_slice %12 {offsets = [0, 3, 0], sizes = [2, 1, 1], strides = [1, 1, 1]} : vector<2x4x1xf32> to vector<2x1x1xf32>
    %51 = vector.broadcast %50 : vector<2x1x1xf32> to vector<2x4x1xf32>
    %52 = arith.mulf %49, %51 : vector<2x4x1xf32>
    %53 = arith.addf %43, %52 : vector<2x4x1xf32>
    %c0_10 = arith.constant 0 : index
    %c0_11 = arith.constant 0 : index
    %c0_12 = arith.constant 0 : index
    %54 = vector.load %arg2[%c0_10, %c0_11, %c0_12] : memref<2x4x1xf32, #tpu.memory_space<vmem>>, vector<2x4x1xf32>
    tpu.vector_store %arg2[%c0_10, %c0_11, %c0_12], %53 {strides = array<i32>} : memref<2x4x1xf32, #tpu.memory_space<vmem>>, vector<2x4x1xf32>,
    return
  }
  func.func @transform_0(%arg0: i32) -> (i32, i32, i32) {
    %c0_i32 = arith.constant 0 : i32
    %c0_i32_0 = arith.constant 0 : i32
    %c0_i32_1 = arith.constant 0 : i32
    return %arg0, %c0_i32, %c0_i32_0 : i32, i32, i32
  }
  func.func @transform_1(%arg0: i32) -> (i32, i32, i32) {
    %c0_i32 = arith.constant 0 : i32
    %c0_i32_0 = arith.constant 0 : i32
    %c0_i32_1 = arith.constant 0 : i32
    return %arg0, %c0_i32, %c0_i32_0 : i32, i32, i32
  }
}

</mosaic_0001>

<bundles_post_ra>
// kernel: tpu_custom_call.1
= control target key start
LH: loop header
LB: loop body
LE: loop exit
PB: predicated region body
PF: predicated region fallthrough
CT: control target
= control target key end

     0   :  { %6 = vsyncpa [#allocation3], 0  ;;  %s625_s0 = inlined_call_operand.hbm [shape: f32[2,4,256], index: 0, kind: input, shape index: {}]   ;;  %s626_s1 = inlined_call_operand.hbm [shape: f32[2,4,1], index: 1, kind: output, shape index: {}]  }
   0x1   :  { %7 = vsyncpa [#allocation4], 0  ;;  %s486_s6 = smov [#allocation2]   ;;  %s438_s10 = scalar_lea.hbm %s625_s0, 256 }
   0x2   :  { %s13_s7 = sshll.u32 %s486_s6, 4  ;;  %p439_p0 = scmp.ne.s32.totalorder %s625_s0, %s438_s10  ;;  %s14_s7 = int_to_ptr.vmem [resolvable:$true] %s13_s7 }
   0x3   :  { %p442_p1 = scmp.lt.u32.totalorder %s438_s10, %s625_s0 }
   0x5   :  { %p444_p2 = pnand %p442_p1, %p439_p0 }
   0x7   :  { %447 = shalt.err (!%p444_p2)
}
   0x8   :  { %s448_s15 = scalar_lea.vmem %s14_s7, 256  ;;  %p453_p4 = scmp.lt.s32.totalorder %s14_s7, %s14_s7 }
   0x9   :  { %p449_p3 = scmp.ne.s32.totalorder %s14_s7, %s448_s15  ;;  %p454_p5 = scmp.lt.s32.totalorder %s448_s15, %s448_s15 }
   0xb   :  { %p455_p6 = por %p454_p5, %p453_p4 }
   0xd   :  { %p456_p7 = pnand %p455_p6, %p449_p3 }
   0xf   :  { %459 = shalt.err (!%p456_p7)
}
  0x10   :  { %s487_s16 = smov 128   ;;  %s488_s17 = smov 8  }
  0x11   :  { %19 = dma.hbm_to_vmem [thread:$0]  %s625_s0, 256, %s14_s7, [#allocation3], %s487_s16, %s487_s16, %s488_s17  }
  0x12   :  { %482 = dma.done.wait [#allocation3], 256  }
  0x13   :  { %483 = vsyncadd [#allocation3], 4294967040  ;;  %vm31_vm0 = vcmask 1043456   ;;  %v515_v0 = vld [vmem:[#allocation2] sm:$0xff]  ;;  %v517_v1 = vld [vmem:[#allocation2 + $0x8] sm:$0xff]  ;;  %v47_v18 = vlaneseq  ;;  %vm401_vm1 = vcmask 3072  }
  0x14   :  { %v27_v2 = vcombine.high %v515_v0, %v515_v0  ;;  %v32_v3 = vsel %vm31_vm0, %v515_v0, -inf  ;;  %v28_v4 = vcombine.high %v517_v1, %v517_v1  ;;  %v37_v6 = vsel %vm31_vm0, %v517_v1, -inf  ;;  %s490_s0 = smov [#allocation5]  }
  0x15   :  { %v89_v10 = vsel %vm31_vm0, %v517_v1, 0.0  ;;  %v84_v12 = vsel %vm31_vm0, %v515_v0, 0.0  ;;  %v489_v16 = vmov 839922192   ;;  %v48_v20 = vshrl.u32 %v47_v18, 7  ;;  %s409_s20 = sshll.u32 %s490_s0, 4  ;;  %s410_s20 = int_to_ptr.vmem [resolvable:$true] %s409_s20 }
  0x16   :  { %v33_v5 = vsel %vm31_vm0, %v27_v2, -inf  ;;  %v38_v7 = vsel %vm31_vm0, %v28_v4, -inf  ;;  %v90_v11 = vsel %vm31_vm0, %v28_v4, 0.0  ;;  %v85_v13 = vsel %vm31_vm0, %v27_v2, 0.0  ;;  %s460_s21 = scalar_lea.vmem %s410_s20, 128  ;;  %p465_p9 = scmp.lt.s32.totalorder %s410_s20, %s410_s20 }
  0x17   :  { %v34_v8 = vmax.f32 %v32_v3, %v33_v5  ;;  %v39_v9 = vmax.f32 %v37_v6, %v38_v7  ;;  %v91_v14 = vadd.f32 %v90_v11, %v89_v10  ;;  %v86_v15 = vadd.f32 %v85_v13, %v84_v12  ;;  %p461_p8 = scmp.ne.s32.totalorder %s410_s20, %s460_s21  ;;  %p466_p10 = scmp.lt.s32.totalorder %s460_s21, %s460_s21 }
  0x18   :  { %v45_v17 = vunpack.c.l.s4 %v489_v16  ;;  %v535_v23 = vsub.s32 0, %v48_v20  ;;  %v103_v24 = vsub.s32 4, %v48_v20  ;;  %v537_v25 = vsub.s32 1, %v48_v20 }
  0x19   :  { %35 = vmax.xlane.f32.xlu0 %v34_v8  ;;  %92 = vadd.xlane.f32.xlu1 %v91_v14  ;;  %v179_v27 = vsub.s32 5, %v48_v20  ;;  %v539_v28 = vsub.s32 2, %v48_v20  ;;  %v255_v30 = vsub.s32 6, %v48_v20  ;;  %v548_v38 = vsub.s32 3, %v48_v20  ;;  %p467_p11 = por %p466_p10, %p465_p9 }
  0x1a   :  { %v46_v19 = vunpack.c.0.s8 %v45_v17  ;;  %v100_v32 = vrot.slane %v515_v0, %v535_v23  ;;  %v104_v33 = vrot.slane %v515_v0, %v103_v24  ;;  %v176_v34 = vrot.slane %v515_v0, %v537_v25 }
  0x1b   :  { %v180_v37 = vrot.slane %v515_v0, %v179_v27  ;;  %v252_v39 = vrot.slane %v515_v0, %v539_v28  ;;  %v331_v40 = vsub.s32 7, %v48_v20  ;;  %v256_v42 = vrot.slane %v515_v0, %v255_v30  ;;  %p468_p12 = pnand %p467_p11, %p461_p8 }
  0x1c   :  { %v49_v21 = vsub.s32 %v46_v19, %v48_v20  ;;  %v120_v43 = vrot.slane %v100_v32, %v535_v23  ;;  %v124_v44 = vrot.slane %v104_v33, %v535_v23  ;;  %v196_v46 = vrot.slane %v176_v34, %v537_v25 }
  0x1d   :  { %40 = vmax.xlane.f32.xlu0 %v39_v9  ;;  %v200_v47 = vrot.slane %v180_v37, %v537_v25  ;;  %v328_v48 = vrot.slane %v515_v0, %v548_v38  ;;  %v108_v49 = vrot.slane %v517_v1, %v535_v23  ;;  %v112_v50 = vrot.slane %v517_v1, %v103_v24 }
  0x1e   :  { %v272_v51 = vrot.slane %v252_v39, %v539_v28  ;;  %v332_v52 = vrot.slane %v515_v0, %v331_v40  ;;  %v276_v53 = vrot.slane %v256_v42, %v539_v28  ;;  %v184_v54 = vrot.slane %v517_v1, %v537_v25 }
  0x1f   :  { %v188_v55 = vrot.slane %v517_v1, %v179_v27  ;;  %v137_v56 = vcombine.low %v120_v43, %v124_v44  ;;  %v213_v57 = vcombine.low %v196_v46, %v200_v47  ;;  %v260_v58 = vrot.slane %v517_v1, %v539_v28 }
  0x20   :  { %v128_v59 = vrot.slane %v108_v49, %v535_v23  ;;  %v132_v60 = vrot.slane %v112_v50, %v535_v23  ;;  %v348_v61 = vrot.slane %v328_v48, %v548_v38  ;;  %v264_v62 = vrot.slane %v517_v1, %v255_v30 }
  0x21   :  { %87 = vadd.xlane.f32.xlu0 %v86_v15  ;;  %v289_v63 = vcombine.low %v272_v51, %v276_v53  ;;  %v208_v2 = vrot.slane %v188_v55, %v537_v25  ;;  %v352_v3 = vrot.slane %v332_v52, %v548_v38  ;;  %v280_v5 = vrot.slane %v260_v58, %v539_v28 }
  0x22   :  { %v336_v6 = vrot.slane %v517_v1, %v548_v38  ;;  %v340_v7 = vrot.slane %v517_v1, %v331_v40  ;;  %v284_v11 = vrot.slane %v264_v62, %v539_v28  ;;  %v138_v12 = vcombine.low %v128_v59, %v132_v60 }
  0x23   :  { %v365_v15 = vcombine.low %v348_v61, %v352_v3 }
  0xa6   :  { %v36_v22 = vpop.xlane.xlu0 %35 }
  0xa7   :  { %v50_v26 = vrot.slane %v36_v22, %v49_v21  ;;  %v356_v22 = vrot.slane %v336_v6, %v548_v38 }
  0xa9   :  { %v60_v29 = vsub.f32 %v515_v0, %v50_v26  ;;  %v204_v0 = vrot.slane %v184_v54, %v537_v25 }
  0xaa   :  { %v41_v31 = vpop.xlane.xlu0 %40 }
  0xab   :  { %v62_v35 = vmul.f32 1.442695, %v60_v29  ;;  %v57_v36 = vrot.slane %v41_v31, %v49_v21  ;;  %v214_v14 = vcombine.low %v204_v0, %v208_v2  ;;  %v290_v29 = vcombine.low %v280_v5, %v284_v11  ;;  %v93_v5 = vpop.xlane.xlu1 %92 }
  0xad   :  { %430 = vpow2.f32 %v62_v35  ;;  %v61_v41 = vsub.f32 %v517_v1, %v57_v36  ;;  %v360_v1 = vrot.slane %v340_v7, %v548_v38 }
  0xae   :  { %v88_v6 = vpop.xlane.xlu0 %87 }
  0xaf   :  { %v64_v45 = vmul.f32 1.442695, %v61_v41  ;;  %v366_v44 = vcombine.low %v356_v22, %v360_v1  ;;  %v95_v11 = vmul.f32 0.00390625, %v88_v6 }
  0xb1   :  { %432 = vpow2.f32 %v64_v45 }
  0xb7   :  { %v431_v4 = vpop.eup %430 }
  0xb8   :  { %v68_v8 = vcombine.high %v431_v4, %v431_v4  ;;  %v141_v9 = vmul.f32 %v431_v4, %v137_v56  ;;  %v217_v10 = vmul.f32 %v431_v4, %v213_v57  ;;  %v293_v13 = vmul.f32 %v431_v4, %v289_v63 }
  0xb9   :  { %v72_v16 = vsel %vm31_vm0, %v431_v4, 0.0  ;;  %v369_v33 = vmul.f32 %v431_v4, %v365_v15  ;;  %v96_v15 = vmul.f32 0.00390625, %v93_v5 }
  0xba   :  { %v73_v17 = vsel %vm31_vm0, %v68_v8, 0.0  ;;  %v145_v18 = vcombine.high %v141_v9, %v141_v9  ;;  %v221_v19 = vcombine.high %v217_v10, %v217_v10  ;;  %v149_v24 = vsel %vm31_vm0, %v141_v9, 0.0 }
  0xbb   :  { %v433_v20 = vpop.eup %432  ;;  %v74_v21 = vadd.f32 %v73_v17, %v72_v16  ;;  %v297_v32 = vcombine.high %v293_v13, %v293_v13  ;;  %v225_v41 = vsel %vm31_vm0, %v217_v10, 0.0  ;;  %v373_v49 = vcombine.high %v369_v33, %v369_v33 }
  0xbc   :  { %v150_v26 = vsel %vm31_vm0, %v145_v18, 0.0  ;;  %v69_v27 = vcombine.high %v433_v20, %v433_v20  ;;  %v142_v31 = vmul.f32 %v433_v20, %v138_v12  ;;  %v77_v34 = vsel %vm31_vm0, %v433_v20, 0.0 }
  0xbd   :  { %75 = vadd.xlane.f32.xlu1 %v74_v21  ;;  %v151_v30 = vadd.f32 %v150_v26, %v149_v24  ;;  %v226_v36 = vsel %vm31_vm0, %v221_v19, 0.0  ;;  %v218_v37 = vmul.f32 %v433_v20, %v214_v14  ;;  %v294_v43 = vmul.f32 %v433_v20, %v290_v29 }
  0xbe   :  { %v78_v35 = vsel %vm31_vm0, %v69_v27, 0.0  ;;  %v146_v40 = vcombine.high %v142_v31, %v142_v31  ;;  %v227_v45 = vadd.f32 %v226_v36, %v225_v41  ;;  %v154_v47 = vsel %vm31_vm0, %v142_v31, 0.0 }
  0xbf   :  { %152 = vadd.xlane.f32.xlu0 %v151_v30  ;;  %v79_v39 = vadd.f32 %v78_v35, %v77_v34  ;;  %v222_v42 = vcombine.high %v218_v37, %v218_v37  ;;  %v302_v48 = vsel %vm31_vm0, %v297_v32, 0.0  ;;  %v301_v51 = vsel %vm31_vm0, %v293_v13, 0.0 }
  0xc0   :  { %v155_v46 = vsel %vm31_vm0, %v146_v40, 0.0  ;;  %v298_v53 = vcombine.high %v294_v43, %v294_v43  ;;  %v370_v54 = vmul.f32 %v433_v20, %v366_v44  ;;  %v303_v55 = vadd.f32 %v302_v48, %v301_v51 }
  0xc1   :  { %80 = vadd.xlane.f32.xlu1 %v79_v39  ;;  %v156_v50 = vadd.f32 %v155_v46, %v154_v47  ;;  %v231_v52 = vsel %vm31_vm0, %v222_v42, 0.0  ;;  %v230_v56 = vsel %vm31_vm0, %v218_v37, 0.0  ;;  %v378_v57 = vsel %vm31_vm0, %v373_v49, 0.0 }
  0xc2   :  { %v232_v58 = vadd.f32 %v231_v52, %v230_v56  ;;  %v377_v59 = vsel %vm31_vm0, %v369_v33, 0.0  ;;  %v307_v60 = vsel %vm31_vm0, %v298_v53, 0.0  ;;  %v374_v61 = vcombine.high %v370_v54, %v370_v54 }
  0xc3   :  { %228 = vadd.xlane.f32.xlu0 %v227_v45  ;;  %v379_v62 = vadd.f32 %v378_v57, %v377_v59  ;;  %v306_v63 = vsel %vm31_vm0, %v294_v43, 0.0  ;;  %v382_v3 = vsel %vm31_vm0, %v370_v54, 0.0  ;;  %v164_v16 = vrot.slane %v95_v11, %v535_v23 }
  0xc4   :  { %v308_v0 = vadd.f32 %v307_v60, %v306_v63  ;;  %v383_v2 = vsel %vm31_vm0, %v374_v61, 0.0  ;;  %v240_v18 = vrot.slane %v95_v11, %v537_v25  ;;  %v316_v24 = vrot.slane %v95_v11, %v539_v28 }
  0xc5   :  { %157 = vadd.xlane.f32.xlu1 %v156_v50  ;;  %v384_v4 = vadd.f32 %v383_v2, %v382_v3  ;;  %v168_v29 = vrot.slane %v96_v15, %v535_v23  ;;  %v244_v30 = vrot.slane %v96_v15, %v537_v25  ;;  %v392_v31 = vrot.slane %v95_v11, %v548_v38 }
  0xc6   :  { %v320_v40 = vrot.slane %v96_v15, %v539_v28  ;;  %v396_v47 = vrot.slane %v96_v15, %v548_v38 }
  0xc7   :  { %304 = vadd.xlane.f32.xlu0 %v303_v55 }
  0xc9   :  { %233 = vadd.xlane.f32.xlu1 %v232_v58 }
  0xcb   :  { %380 = vadd.xlane.f32.xlu0 %v379_v62 }
  0xcd   :  { %309 = vadd.xlane.f32.xlu1 %v308_v0 }
  0xd1   :  { %385 = vadd.xlane.f32.xlu1 %v384_v4 }
 0x14a   :  { %v76_v7 = vpop.xlane.xlu1 %75 }
 0x14b   :  { %434 = vrcp.f32 %v76_v7 }
 0x14c   :  { %v153_v8 = vpop.xlane.xlu0 %152 }
 0x14e   :  { %v81_v9 = vpop.xlane.xlu1 %80 }
 0x14f   :  { %436 = vrcp.f32 %v81_v9 }
 0x150   :  { %v229_v10 = vpop.xlane.xlu0 %228 }
 0x152   :  { %v158_v12 = vpop.xlane.xlu1 %157 }
 0x154   :  { %v305_v13 = vpop.xlane.xlu0 %304 }
 0x155   :  { %v435_v14 = vpop.eup %434 }
 0x156   :  { %v159_v17 = vmul.f32 %v435_v14, %v153_v8  ;;  %v235_v19 = vmul.f32 %v435_v14, %v229_v10  ;;  %v311_v20 = vmul.f32 %v435_v14, %v305_v13  ;;  %v234_v21 = vpop.xlane.xlu1 %233 }
 0x158   :  { %v169_v22 = vmul.f32 %v164_v16, %v159_v17  ;;  %v245_v1 = vmul.f32 %v240_v18, %v235_v19  ;;  %v381_v26 = vpop.xlane.xlu0 %380  ;;  %v321_v35 = vmul.f32 %v316_v24, %v311_v20 }
 0x159   :  { %v437_v27 = vpop.eup %436  ;;  %v387_v32 = vmul.f32 %v435_v14, %v381_v26 }
 0x15a   :  { %v247_v33 = vadd.f32 %v245_v1, %v169_v22  ;;  %v160_v34 = vmul.f32 %v437_v27, %v158_v12  ;;  %v236_v36 = vmul.f32 %v437_v27, %v234_v21  ;;  %v310_v37 = vpop.xlane.xlu1 %309 }
 0x15b   :  { %v397_v39 = vmul.f32 %v392_v31, %v387_v32  ;;  %v312_v41 = vmul.f32 %v437_v27, %v310_v37 }
 0x15c   :  { %v170_v42 = vmul.f32 %v168_v29, %v160_v34  ;;  %v323_v43 = vadd.f32 %v321_v35, %v247_v33  ;;  %v246_v44 = vmul.f32 %v244_v30, %v236_v36 }
 0x15d   :  { %v322_v45 = vmul.f32 %v320_v40, %v312_v41 }
 0x15e   :  { %v248_v23 = vadd.f32 %v246_v44, %v170_v42  ;;  %v399_v46 = vadd.f32 %v397_v39, %v323_v43  ;;  %v386_v25 = vpop.xlane.xlu1 %385 }
 0x15f   :  { %v388_v48 = vmul.f32 %v437_v27, %v386_v25 }
 0x160   :  { %v324_v49 = vadd.f32 %v322_v45, %v248_v23  ;;  %402 = vst.msk [vmem:[#allocation5] sm:$0xf] %vm401_vm1, %v399_v46 }
 0x161   :  { %v398_v50 = vmul.f32 %v396_v47, %v388_v48 }
 0x163   :  { %v400_v51 = vadd.f32 %v398_v50, %v324_v49 }
 0x165   :  { %403 = vst.msk [vmem:[#allocation5 + $0x4] sm:$0xf] %vm401_vm1, %v400_v51 }
 0x166   :  { %471 = shalt.err (!%p468_p12)
}
 0x167   :  { %s472_s24 = scalar_lea.hbm %s626_s1, 128 }
 0x168   :  { %p473_p13 = scmp.ne.s32.totalorder %s626_s1, %s472_s24  ;;  %p476_p0 = scmp.lt.u32.totalorder %s472_s24, %s626_s1 }
 0x16a   :  { %p478_p1 = pnand %p476_p0, %p473_p13 }
 0x16c   :  { %481 = shalt.err (!%p478_p1)
}
 0x16d   :  { %s491_s29 = smov 64   ;;  %s492_s30 = smov 4  }
 0x16e   :  { %415 = dma.vmem_to_hbm [thread:$0]  %s410_s20, 128, %s626_s1, [#allocation4], %s491_s29, %s491_s29, %s492_s30  }
 0x16f   :  { %484 = dma.done.wait [#allocation4], 128  }
 0x170   :  { %485 = vsyncadd [#allocation4], 4294967168 }
 0x171   :  { %419 = vsyncpa [#allocation3], 1 }
 0x172   :  { %420 = vsyncpa [#allocation4], 1 }

</bundles_post_ra>
